<compile_context>
chip_gen: v7x
topology: tpu7x:2x2x1
jax: 0.10.0
libtpu: 0.0.40
codegen_flags: <defaults>
</compile_context>

<pallas_src>
import functools

import jax
import jax.numpy as jnp
from jax.experimental import pallas as pl
from jax.experimental.pallas import tpu as pltpu

LANE = 128            # TPU lane width
ALIGN = 16            # row alignment (bf16 native sublane tile = 16)
DEFAULT_TB_MAX = 512  # max batch-tile rows per grid step


def _round_up(n, m):
    return ((n + m - 1) // m) * m


def _device_traits():
    """(bf16_epilogue, num_tensorcores) from the attached TPU generation."""
    try:
        kind = jax.devices()[0].device_kind.lower()
    except Exception:
        kind = ""
    bf16_epilogue = any(t in kind for t in ("v6", "v7", "7x"))   # bf16 VALU
    num_tc = 2 if any(t in kind for t in ("v7", "7x")) else 1    # megacore
    return bf16_epilogue, num_tc


def mlp_kernel(x_ref, w1_ref, b1_ref, w2_ref, b2_ref, w3_ref, b3_ref, o_ref,
               *, bf16_epilogue):
    # fc1 (+ folded bn1) + relu    (x arrives as bf16 from HBM)
    acc1 = jnp.dot(x_ref[...], w1_ref[...], preferred_element_type=jnp.float32)
    if bf16_epilogue:
        h1 = jnp.maximum(acc1.astype(jnp.bfloat16) + b1_ref[...], 0.0)
    else:
        h1 = jnp.maximum(acc1 + b1_ref[...], 0.0).astype(jnp.bfloat16)
    # dropout: identity in eval mode
    # fc2 (+ folded bn2) + relu
    acc2 = jnp.dot(h1, w2_ref[...], preferred_element_type=jnp.float32)
    if bf16_epilogue:
        h2 = jnp.maximum(acc2.astype(jnp.bfloat16) + b2_ref[...], 0.0)
    else:
        h2 = jnp.maximum(acc2 + b2_ref[...], 0.0).astype(jnp.bfloat16)
    # fc3 (output columns lane-padded to 128); bias added in f32, stored bf16
    acc3 = jnp.dot(h2, w3_ref[...], preferred_element_type=jnp.float32) + b3_ref[...]
    o_ref[...] = acc3.astype(o_ref.dtype)


def prepare_kernel_params(params, bf16_epilogue):
    """Fold eval-mode BN into the Linears, pad fc3 to lane width, cast weight
    matrices to bf16.  b1/b2 are bf16 when the epilogue runs in bf16."""
    (w1, b1, s1, t1, w2, b2, s2, t2, w3, b3) = params
    # BN fold: y = (x@W + b) * s + t  ==  x @ (W*s) + (b*s + t)
    w1f = (w1 * s1).astype(jnp.bfloat16)
    b1f = (b1 * s1 + t1)
    w2f = (w2 * s2).astype(jnp.bfloat16)
    b2f = (b2 * s2 + t2)
    bias_dt = jnp.bfloat16 if bf16_epilogue else jnp.float32
    b1f = b1f.astype(bias_dt)
    b2f = b2f.astype(bias_dt)
    # lane-pad the classifier head so the writeback is a dense 128-lane store
    C = w3.shape[1]
    CP = _round_up(max(C, LANE), LANE)
    w3p = jnp.zeros((w3.shape[0], CP), jnp.float32).at[:, :C].set(w3)
    b3p = jnp.zeros((1, CP), jnp.float32).at[:, :C].set(b3)
    kparams = (w1f, b1f, w2f, b2f,
               w3p.astype(jnp.bfloat16), b3p.astype(jnp.float32))
    return kparams, C


def enhanced_nn_forward(x, params, *, tb_max=DEFAULT_TB_MAX,
                        bf16_epilogue=None, num_tc=None):
    if bf16_epilogue is None or num_tc is None:
        d_bf16, d_tc = _device_traits()
        bf16_epilogue = d_bf16 if bf16_epilogue is None else bf16_epilogue
        num_tc = d_tc if num_tc is None else num_tc

    (w1, b1, w2, b2, w3, b3), C = prepare_kernel_params(params, bf16_epilogue)
    B, F = x.shape
    CP = w3.shape[1]

    # --- batch tiling: minimize padding, keep both TCs busy on v7x ---------
    B_aligned = _round_up(B, ALIGN)
    grid = pl.cdiv(B_aligned, tb_max)
    if num_tc >= 2 and B_aligned >= 2 * ALIGN:
        grid = max(grid, 2)                       # give both TensorCores work
    TB = _round_up(pl.cdiv(B, grid), ALIGN)
    B_pad = grid * TB

    # bf16 input stream (kernel rounded to bf16 anyway); pad after the cast.
    x = x.astype(jnp.bfloat16)
    if B_pad != B:
        x = jnp.pad(x, ((0, B_pad - B), (0, 0)))

    kernel = functools.partial(mlp_kernel, bf16_epilogue=bf16_epilogue)

    def full_spec(shape):
        return pl.BlockSpec(shape, lambda i: tuple(0 for _ in shape))

    out = pl.pallas_call(
        kernel,
        out_shape=jax.ShapeDtypeStruct((B_pad, CP), jnp.bfloat16),
        grid_spec=pltpu.PrefetchScalarGridSpec(
            num_scalar_prefetch=0,
            grid=(grid,),
            in_specs=[
                pl.BlockSpec((TB, F), lambda i: (i, 0)),   # x tile
                full_spec(w1.shape), full_spec(b1.shape),
                full_spec(w2.shape), full_spec(b2.shape),
                full_spec(w3.shape), full_spec(b3.shape),
            ],
            out_specs=pl.BlockSpec((TB, CP), lambda i: (i, 0)),
        ),
        compiler_params=pltpu.CompilerParams(
            dimension_semantics=("parallel",)),
    )(x, w1, b1, w2, b2, w3, b3)

    return out[:B, :C].astype(jnp.float32)


def make_params(key, input_size, num_classes):
    """Deterministic synthetic parameters matching EnhancedNN.__init__ shapes."""
    H1, H2 = 256, 128
    eps = 1e-5
    keys = jax.random.split(key, 16)

    def lin(kw, kb, fan_in, fan_out):
        bound = 1.0 / jnp.sqrt(fan_in)
        w = jax.random.uniform(kw, (fan_in, fan_out), jnp.float32, -bound, bound)
        b = jax.random.uniform(kb, (1, fan_out), jnp.float32, -bound, bound)
        return w, b

    w1, b1 = lin(keys[0], keys[1], input_size, H1)
    w2, b2 = lin(keys[2], keys[3], H1, H2)
    w3, b3 = lin(keys[4], keys[5], H2, num_classes)

    def bn(kg, kb, km, kv, n):
        gamma = 1.0 + 0.1 * jax.random.normal(kg, (1, n), jnp.float32)
        beta = 0.1 * jax.random.normal(kb, (1, n), jnp.float32)
        rmean = 0.1 * jax.random.normal(km, (1, n), jnp.float32)
        rvar = 1.0 + 0.1 * jax.random.uniform(kv, (1, n), jnp.float32)
        scale = gamma / jnp.sqrt(rvar + eps)
        shift = beta - rmean * scale
        return scale, shift

    s1, t1 = bn(keys[6], keys[7], keys[8], keys[9], H1)
    s2, t2 = bn(keys[10], keys[11], keys[12], keys[13], H2)

    return (w1, b1, s1, t1, w2, b2, s2, t2, w3, b3)


def reference_forward_f32(x, params):
    """Nominal full-precision forward (fc+bn+relu, dropout=identity, fc+bn+relu, fc)."""
    (w1, b1, s1, t1, w2, b2, s2, t2, w3, b3) = params
    h1 = jnp.maximum((x @ w1 + b1) * s1 + t1, 0.0)
    h2 = jnp.maximum((h1 @ w2 + b2) * s2 + t2, 0.0)
    return h2 @ w3 + b3


def reference_forward_kernel_mirror(x, params, bf16_epilogue):
    """Reference that mirrors the kernel's bf16 rounding for a tight check."""
    (w1, b1, w2, b2, w3, b3), C = prepare_kernel_params(params, bf16_epilogue)
    f32 = lambda a: a.astype(jnp.float32)
    bf = lambda a: a.astype(jnp.bfloat16)
    acc1 = f32(bf(x)) @ f32(w1)
    h1 = (jnp.maximum(bf(acc1) + b1, 0.0) if bf16_epilogue
          else bf(jnp.maximum(acc1 + b1, 0.0)))
    acc2 = f32(h1) @ f32(w2)
    h2 = (jnp.maximum(bf(acc2) + b2, 0.0) if bf16_epilogue
          else bf(jnp.maximum(acc2 + b2, 0.0)))
    acc3 = f32(h2) @ f32(w3) + b3
    return bf(acc3).astype(jnp.float32)[:, :C]


if __name__ == "__main__":
    key = jax.random.PRNGKey(0)
    kx, kp = jax.random.split(key)

    batch = 8
    input_size = 256          # synthetic flattened-LBP feature length
    num_classes = 5           # len(classes)

    x = jax.random.normal(kx, (batch, input_size), jnp.float32)
    params = make_params(kp, input_size, num_classes)

    bf16_epilogue, num_tc = _device_traits()

    out = enhanced_nn_forward(x, params,
                              bf16_epilogue=bf16_epilogue, num_tc=num_tc)
    out = jax.block_until_ready(out)

    assert out.shape == (batch, num_classes)

    # Tight check against a reference that mirrors the kernel's bf16 rounding.
    ref_mirror = reference_forward_kernel_mirror(x, params, bf16_epilogue)
    assert jnp.allclose(out, ref_mirror, atol=1e-2, rtol=1e-2)

    # Sanity check against the nominal full-f32 forward (loose, bf16 noise).
    ref_f32 = reference_forward_f32(x, params)
    assert jnp.allclose(out, ref_f32, atol=1e-1, rtol=1e-1)

    print("KERNEL_OK")
</pallas_src>

<mosaic_0001>
module attributes {stable_mosaic.version = 11 : i64} {
  func.func @mlp_kernel(%arg0: i32, %arg1: memref<16x256xbf16, #tpu.memory_space<vmem>>, %arg2: memref<256x256xbf16, #tpu.memory_space<vmem>>, %arg3: memref<1x256xf32, #tpu.memory_space<vmem>>, %arg4: memref<256x128xbf16, #tpu.memory_space<vmem>>, %arg5: memref<1x128xf32, #tpu.memory_space<vmem>>, %arg6: memref<128x128xbf16, #tpu.memory_space<vmem>>, %arg7: memref<1x128xf32, #tpu.memory_space<vmem>>, %arg8: memref<16x128xbf16, #tpu.memory_space<vmem>>) attributes {dimension_semantics = [#tpu.dimension_semantics<parallel>], iteration_bounds = array<i64: 1>, scalar_prefetch = 0 : i64, scratch_operands = 0 : i64, tpu.core_type = #tpu.core_type<tc>, window_params = [{transform_indices = @transform_0, window_bounds = array<i64: 16, 256>}, {pipeline_mode = #tpu.pipeline_mode<synchronous>, transform_indices = @transform_1, window_bounds = array<i64: 256, 256>}, {pipeline_mode = #tpu.pipeline_mode<synchronous>, transform_indices = @transform_2, window_bounds = array<i64: 1, 256>}, {pipeline_mode = #tpu.pipeline_mode<synchronous>, transform_indices = @transform_3, window_bounds = array<i64: 256, 128>}, {pipeline_mode = #tpu.pipeline_mode<synchronous>, transform_indices = @transform_4, window_bounds = array<i64: 1, 128>}, {pipeline_mode = #tpu.pipeline_mode<synchronous>, transform_indices = @transform_5, window_bounds = array<i64: 128, 128>}, {pipeline_mode = #tpu.pipeline_mode<synchronous>, transform_indices = @transform_6, window_bounds = array<i64: 1, 128>}, {transform_indices = @transform_7, window_bounds = array<i64: 16, 128>}]} {
    %c0 = arith.constant 0 : index
    %c0_0 = arith.constant 0 : index
    %0 = vector.load %arg1[%c0, %c0_0] : memref<16x256xbf16, #tpu.memory_space<vmem>>, vector<16x256xbf16>
    %c0_1 = arith.constant 0 : index
    %c0_2 = arith.constant 0 : index
    %1 = vector.load %arg2[%c0_1, %c0_2] : memref<256x256xbf16, #tpu.memory_space<vmem>>, vector<256x256xbf16>
    %cst = arith.constant dense<0.000000e+00> : vector<16x256xf32>
    %2 = tpu.matmul %0, %1, %cst {dimension_numbers = #tpu.dot_dimension_numbers<[1], [0], [0], [1], [0, 0, 1, 1], [], []>} : vector<16x256xbf16>, vector<256x256xbf16>, vector<16x256xf32> -> vector<16x256xf32>
    %c0_3 = arith.constant 0 : index
    %c0_4 = arith.constant 0 : index
    %3 = vector.load %arg3[%c0_3, %c0_4] : memref<1x256xf32, #tpu.memory_space<vmem>>, vector<1x256xf32>
    %4 = vector.broadcast %3 : vector<1x256xf32> to vector<16x256xf32>
    %5 = arith.addf %2, %4 : vector<16x256xf32>
    %cst_5 = arith.constant 0.000000e+00 : f32
    %6 = vector.broadcast %cst_5 : f32 to vector<16x256xf32>
    %7 = arith.maximumf %5, %6 : vector<16x256xf32>
    %8 = arith.truncf %7 : vector<16x256xf32> to vector<16x256xbf16>
    %c0_6 = arith.constant 0 : index
    %c0_7 = arith.constant 0 : index
    %9 = vector.load %arg4[%c0_6, %c0_7] : memref<256x128xbf16, #tpu.memory_space<vmem>>, vector<256x128xbf16>
    %cst_8 = arith.constant dense<0.000000e+00> : vector<16x128xf32>
    %10 = tpu.matmul %8, %9, %cst_8 {dimension_numbers = #tpu.dot_dimension_numbers<[1], [0], [0], [1], [0, 0, 1, 1], [], []>} : vector<16x256xbf16>, vector<256x128xbf16>, vector<16x128xf32> -> vector<16x128xf32>
    %c0_9 = arith.constant 0 : index
    %c0_10 = arith.constant 0 : index
    %11 = vector.load %arg5[%c0_9, %c0_10] : memref<1x128xf32, #tpu.memory_space<vmem>>, vector<1x128xf32>
    %12 = vector.broadcast %11 : vector<1x128xf32> to vector<16x128xf32>
    %13 = arith.addf %10, %12 : vector<16x128xf32>
    %cst_11 = arith.constant 0.000000e+00 : f32
    %14 = vector.broadcast %cst_11 : f32 to vector<16x128xf32>
    %15 = arith.maximumf %13, %14 : vector<16x128xf32>
    %16 = arith.truncf %15 : vector<16x128xf32> to vector<16x128xbf16>
    %c0_12 = arith.constant 0 : index
    %c0_13 = arith.constant 0 : index
    %17 = vector.load %arg6[%c0_12, %c0_13] : memref<128x128xbf16, #tpu.memory_space<vmem>>, vector<128x128xbf16>
    %cst_14 = arith.constant dense<0.000000e+00> : vector<16x128xf32>
    %18 = tpu.matmul %16, %17, %cst_14 {dimension_numbers = #tpu.dot_dimension_numbers<[1], [0], [0], [1], [0, 0, 1, 1], [], []>} : vector<16x128xbf16>, vector<128x128xbf16>, vector<16x128xf32> -> vector<16x128xf32>
    %c0_15 = arith.constant 0 : index
    %c0_16 = arith.constant 0 : index
    %19 = vector.load %arg7[%c0_15, %c0_16] : memref<1x128xf32, #tpu.memory_space<vmem>>, vector<1x128xf32>
    %20 = vector.broadcast %19 : vector<1x128xf32> to vector<16x128xf32>
    %21 = arith.addf %18, %20 : vector<16x128xf32>
    %22 = arith.truncf %21 : vector<16x128xf32> to vector<16x128xbf16>
    %c0_17 = arith.constant 0 : index
    %c0_18 = arith.constant 0 : index
    %23 = vector.load %arg8[%c0_17, %c0_18] : memref<16x128xbf16, #tpu.memory_space<vmem>>, vector<16x128xbf16>
    tpu.vector_store %arg8[%c0_17, %c0_18], %22 {strides = array<i32>} : memref<16x128xbf16, #tpu.memory_space<vmem>>, vector<16x128xbf16>,
    return
  }
  func.func @transform_0(%arg0: i32) -> (i32, i32) {
    %c0_i32 = arith.constant 0 : i32
    %c0_i32_0 = arith.constant 0 : i32
    return %arg0, %c0_i32 : i32, i32
  }
  func.func @transform_1(%arg0: i32) -> (i32, i32) {
    %c0_i32 = arith.constant 0 : i32
    %c0_i32_0 = arith.constant 0 : i32
    %c0_i32_1 = arith.constant 0 : i32
    return %c0_i32, %c0_i32_0 : i32, i32
  }
  func.func @transform_2(%arg0: i32) -> (i32, i32) {
    %c0_i32 = arith.constant 0 : i32
    %c0_i32_0 = arith.constant 0 : i32
    %c0_i32_1 = arith.constant 0 : i32
    return %c0_i32, %c0_i32_0 : i32, i32
  }
  func.func @transform_3(%arg0: i32) -> (i32, i32) {
    %c0_i32 = arith.constant 0 : i32
    %c0_i32_0 = arith.constant 0 : i32
    %c0_i32_1 = arith.constant 0 : i32
    return %c0_i32, %c0_i32_0 : i32, i32
  }
  func.func @transform_4(%arg0: i32) -> (i32, i32) {
    %c0_i32 = arith.constant 0 : i32
    %c0_i32_0 = arith.constant 0 : i32
    %c0_i32_1 = arith.constant 0 : i32
    return %c0_i32, %c0_i32_0 : i32, i32
  }
  func.func @transform_5(%arg0: i32) -> (i32, i32) {
    %c0_i32 = arith.constant 0 : i32
    %c0_i32_0 = arith.constant 0 : i32
    %c0_i32_1 = arith.constant 0 : i32
    return %c0_i32, %c0_i32_0 : i32, i32
  }
  func.func @transform_6(%arg0: i32) -> (i32, i32) {
    %c0_i32 = arith.constant 0 : i32
    %c0_i32_0 = arith.constant 0 : i32
    %c0_i32_1 = arith.constant 0 : i32
    return %c0_i32, %c0_i32_0 : i32, i32
  }
  func.func @transform_7(%arg0: i32) -> (i32, i32) {
    %c0_i32 = arith.constant 0 : i32
    %c0_i32_0 = arith.constant 0 : i32
    return %arg0, %c0_i32 : i32, i32
  }
}

</mosaic_0001>

<bundles_post_ra>
// kernel: tpu_custom_call.1
= control target key start
LH: loop header
LB: loop body
LE: loop exit
PB: predicated region body
PF: predicated region fallthrough
CT: control target
= control target key end

     0   :  { %12 = vsyncpa [#allocation3], 0  ;;  %s1128_s0 = inlined_call_operand.hbm [shape: bf16[16,256], index: 0, kind: input, shape index: {}]   ;;  %s1129_s1 = inlined_call_operand.hbm [shape: bf16[256,256], index: 1, kind: input, shape index: {}]   ;;  %s1130_s2 = inlined_call_operand.vmem [shape: f32[1,256], index: 2, kind: input, shape index: {}]   ;;  %s1131_s3 = inlined_call_operand.hbm [shape: bf16[256,128], index: 3, kind: input, shape index: {}]   ;;  %s1132_s4 = inlined_call_operand.vmem [shape: f32[1,128], index: 4, kind: input, shape index: {}]   ;;  %s1133_s5 = inlined_call_operand.hbm [shape: bf16[128,128], index: 5, kind: input, shape index: {}]   ;;  %s1134_s6 = inlined_call_operand.vmem [shape: f32[1,128], index: 6, kind: input, shape index: {}]   ;;  %s1135_s7 = inlined_call_operand.hbm [shape: bf16[16,128], index: 7, kind: output, shape index: {}]  }
   0x1   :  { %13 = vsyncpa [#allocation6], 0 }
   0x2   :  { %14 = vsyncpa [#allocation9], 0 }
   0x3   :  { %15 = vsyncpa [#allocation4], 0  ;;  %s992_s24 = smov [#allocation5]   ;;  %s993_s26 = smov [#allocation2]  }
   0x4   :  { %s33_s25 = sshll.u32 %s992_s24, 4  ;;  %s21_s27 = sshll.u32 %s993_s26, 4  ;;  %s34_s25 = int_to_ptr.vmem [resolvable:$true] %s33_s25  ;;  %s1043_s27 = int_to_ptr.vmem [resolvable:$true] %s21_s27 }
   0x5   :  { %s874_s30 = scalar_lea.hbm %s1129_s1, 4096 }
   0x6   :  { %p875_p0 = scmp.ne.s32.totalorder %s1129_s1, %s874_s30  ;;  %p878_p1 = scmp.lt.u32.totalorder %s874_s30, %s1129_s1 }
   0x8   :  { %p880_p2 = pnand %p878_p1, %p875_p0 }
   0xa   :  { %883 = shalt.err (!%p880_p2)
}
   0xb   :  { %s884_s12 = scalar_lea.vmem %s34_s25, 4096  ;;  %p889_p4 = scmp.lt.s32.totalorder %s34_s25, %s34_s25 }
   0xc   :  { %p885_p3 = scmp.ne.s32.totalorder %s34_s25, %s884_s12  ;;  %p890_p5 = scmp.lt.s32.totalorder %s884_s12, %s884_s12 }
   0xe   :  { %p891_p6 = por %p890_p5, %p889_p4 }
  0x10   :  { %p892_p7 = pnand %p891_p6, %p885_p3 }
  0x12   :  { %895 = shalt.err (!%p892_p7)
}
  0x13   :  { %s994_s13 = smov 128   ;;  %s995_s14 = smov 8  }
  0x14   :  { %39 = dma.hbm_to_vmem [thread:$0]  %s1129_s1, 4096, %s34_s25, [#allocation6], %s994_s13, %s994_s13, %s995_s14  }
  0x15   :  { %s896_s19 = scalar_lea.hbm %s1128_s0, 256 }
  0x16   :  { %p897_p8 = scmp.ne.s32.totalorder %s1128_s0, %s896_s19  ;;  %p900_p9 = scmp.lt.u32.totalorder %s896_s19, %s1128_s0 }
  0x18   :  { %p902_p10 = pnand %p900_p9, %p897_p8 }
  0x1a   :  { %905 = shalt.err (!%p902_p10)
}
  0x1b   :  { %s906_s24 = scalar_lea.vmem %s1043_s27, 256  ;;  %p911_p12 = scmp.lt.s32.totalorder %s1043_s27, %s1043_s27 }
  0x1c   :  { %p907_p11 = scmp.ne.s32.totalorder %s1043_s27, %s906_s24  ;;  %p912_p13 = scmp.lt.s32.totalorder %s906_s24, %s906_s24 }
  0x1e   :  { %p913_p0 = por %p912_p13, %p911_p12 }
  0x20   :  { %p914_p1 = pnand %p913_p0, %p907_p11 }
  0x22   :  { %917 = shalt.err (!%p914_p1)
}
  0x23   :  { %27 = dma.hbm_to_vmem [thread:$0]  %s1128_s0, 256, %s1043_s27, [#allocation3], %s994_s13, %s994_s13, %s995_s14  }
  0x24   :  { %s996_s26 = smov [#allocation7]   ;;  %s918_s8 = scalar_lea.hbm %s1131_s3, 2048 }
  0x25   :  { %s47_s28 = sshll.u32 %s996_s26, 4  ;;  %p919_p2 = scmp.ne.s32.totalorder %s1131_s3, %s918_s8  ;;  %s48_s28 = int_to_ptr.vmem [resolvable:$true] %s47_s28 }
  0x26   :  { %p922_p3 = scmp.lt.u32.totalorder %s918_s8, %s1131_s3 }
  0x28   :  { %p924_p4 = pnand %p922_p3, %p919_p2 }
  0x2a   :  { %927 = shalt.err (!%p924_p4)
}
  0x2b   :  { %s928_s15 = scalar_lea.vmem %s48_s28, 2048  ;;  %p933_p6 = scmp.lt.s32.totalorder %s48_s28, %s48_s28 }
  0x2c   :  { %p929_p5 = scmp.ne.s32.totalorder %s48_s28, %s928_s15  ;;  %p934_p7 = scmp.lt.s32.totalorder %s928_s15, %s928_s15 }
  0x2e   :  { %p935_p8 = por %p934_p7, %p933_p6 }
  0x30   :  { %p936_p9 = pnand %p935_p8, %p929_p5 }
  0x32   :  { %939 = shalt.err (!%p936_p9)
}
  0x33   :  { %s997_s0 = smov 64   ;;  %s998_s27 = smov 4  }
  0x34   :  { %53 = dma.hbm_to_vmem [thread:$0]  %s1131_s3, 2048, %s48_s28, [#allocation6], %s997_s0, %s997_s0, %s998_s27  }
  0x35   :  { %s999_s16 = smov [#allocation8]   ;;  %s940_s20 = scalar_lea.hbm %s1133_s5, 1024 }
  0x36   :  { %s61_s17 = sshll.u32 %s999_s16, 4  ;;  %p941_p10 = scmp.ne.s32.totalorder %s1133_s5, %s940_s20  ;;  %s62_s17 = int_to_ptr.vmem [resolvable:$true] %s61_s17 }
  0x37   :  { %p944_p11 = scmp.lt.u32.totalorder %s940_s20, %s1133_s5 }
  0x39   :  { %p946_p12 = pnand %p944_p11, %p941_p10 }
  0x3b   :  { %949 = shalt.err (!%p946_p12)
}
  0x3c   :  { %s950_s1 = scalar_lea.vmem %s62_s17, 1024  ;;  %p955_p0 = scmp.lt.s32.totalorder %s62_s17, %s62_s17 }
  0x3d   :  { %p951_p13 = scmp.ne.s32.totalorder %s62_s17, %s950_s1  ;;  %p956_p1 = scmp.lt.s32.totalorder %s950_s1, %s950_s1 }
  0x3f   :  { %p957_p2 = por %p956_p1, %p955_p0 }
  0x41   :  { %p958_p3 = pnand %p957_p2, %p951_p13 }
  0x43   :  { %961 = shalt.err (!%p958_p3)
}
  0x44   :  { %67 = dma.hbm_to_vmem [thread:$0]  %s1133_s5, 1024, %s62_s17, [#allocation9], %s997_s0, %s997_s0, %s998_s27  }
  0x45   :  { %984 = dma.done.wait [#allocation3], 256  }
  0x46   :  { %985 = vsyncadd [#allocation3], 4294967040 }
  0x47   :  { %986 = dma.done.wait [#allocation6], 6144  }
  0x48   :  { %987 = vsyncadd [#allocation6], 4294961152 }
  0x49   :  { %988 = dma.done.wait [#allocation9], 1024  }
  0x4a   :  { %989 = vsyncadd [#allocation9], 4294966272  ;;  %v799_v0 = vld [vmem:[#allocation5 + $0x4] ss:$8 sps:$4 sm:$0xff]   ;;  %v801_v1 = vld [vmem:[#allocation5] ss:$8 sps:$4 sm:$0xff]   ;;  %v119_v51 = vlaneseq }
  0x4b   :  { %299 = vmatprep.subr.bf16.mxu0 %v799_v0  ;;  %v802_v2 = vld [vmem:[#allocation5 + $0x14] ss:$8 sps:$4 sm:$0xff]   ;;  %v804_v3 = vld [vmem:[#allocation5 + $0x10] ss:$8 sps:$4 sm:$0xff]   ;;  %v805_v4 = vld [vmem:[#allocation5 + $0x24] ss:$8 sps:$4 sm:$0xff]  }
  0x4c   :  { %300 = vmatpush1.bf16.msra.mxu0 %v801_v1  ;;  %v807_v5 = vld [vmem:[#allocation5 + $0x20] ss:$8 sps:$4 sm:$0xff]   ;;  %v808_v6 = vld [vmem:[#allocation5 + $0x34] ss:$8 sps:$4 sm:$0xff]   ;;  %v810_v7 = vld [vmem:[#allocation5 + $0x30] ss:$8 sps:$4 sm:$0xff]  }
  0x4d   :  { %301 = vmatprep.subr.bf16.mxu0 %v802_v2  ;;  %v811_v8 = vld [vmem:[#allocation5 + $0x44] ss:$8 sps:$4 sm:$0xff]   ;;  %v813_v9 = vld [vmem:[#allocation5 + $0x40] ss:$8 sps:$4 sm:$0xff]   ;;  %v814_v10 = vld [vmem:[#allocation5 + $0x54] ss:$8 sps:$4 sm:$0xff]  }
  0x4e   :  { %v816_v11 = vld [vmem:[#allocation5 + $0x50] ss:$8 sps:$4 sm:$0xff]   ;;  %v817_v12 = vld [vmem:[#allocation5 + $0x64] ss:$8 sps:$4 sm:$0xff]   ;;  %v819_v13 = vld [vmem:[#allocation5 + $0x60] ss:$8 sps:$4 sm:$0xff]  }
  0x4f   :  { %v820_v14 = vld [vmem:[#allocation5 + $0x74] ss:$8 sps:$4 sm:$0xff]   ;;  %v850_v16 = vld [vmem:[#allocation7 + $0x40] sm:$0xff]   ;;  %v822_v18 = vld [vmem:[#allocation5 + $0x70] ss:$8 sps:$4 sm:$0xff]   ;;  %v1000_v50 = vmov 0.0  }
  0x50   :  { %302 = vmatpush1.bf16.msra.mxu0 %v804_v3  ;;  %v849_v15 = vld [vmem:[#allocation2 + $0x4] ss:$8 sps:$4 sm:$0xff]   ;;  %v851_v17 = vld [vmem:[#allocation7] sm:$0xff]   ;;  %737 = vmatprep.subr.bf16.mxu1 %v850_v16  ;;  %v852_v19 = vld [vmem:[#allocation7 + $0x48] sm:$0xff]   ;;  %v120_v52 = vshrl.u32 %v119_v51, 7  ;;  %vm1001_vm0 = vmmov 0  }
  0x51   :  { %303 = vmatprep.subr.bf16.mxu0 %v805_v4  ;;  %331 = vmatprep.mubr.bf16.mxu0 %v849_v15  ;;  %v853_v20 = vld [vmem:[#allocation7 + $0x8] sm:$0xff]   ;;  %v854_v21 = vld [vmem:[#allocation7 + $0x50] sm:$0xff]   ;;  %v856_v25 = vld [vmem:[#allocation7 + $0x58] sm:$0xff]   ;;  %s1002_s8 = smov [#allocation10]  }
  0x52   :  { %738 = vmatpush3.bf16.msra.mxu1 %v851_v17  ;;  %v823_v22 = vld [vmem:[#allocation5 + $0x84] ss:$8 sps:$4 sm:$0xff]   ;;  %v825_v23 = vld [vmem:[#allocation5 + $0x80] ss:$8 sps:$4 sm:$0xff]   ;;  %v855_v24 = vld [vmem:[#allocation7 + $0x10] sm:$0xff]   ;;  %v121_v53 = vsub.s32 0, %v120_v52 }
  0x53   :  { %739 = vmatprep.subr.bf16.mxu1 %v852_v19  ;;  %v826_v26 = vld [vmem:[#allocation5 + $0x94] ss:$8 sps:$4 sm:$0xff]   ;;  %v828_v27 = vld [vmem:[#allocation5 + $0x90] ss:$8 sps:$4 sm:$0xff]   ;;  %v858_v29 = vld [vmem:[#allocation7 + $0x60] sm:$0xff]   ;;  %v125_v55 = vsub.s32 1, %v120_v52 }
  0x54   :  { %304 = vmatpush1.bf16.msra.mxu0 %v807_v5  ;;  %v857_v28 = vld [vmem:[#allocation7 + $0x18] sm:$0xff]   ;;  %v829_v30 = vld [vmem:[#allocation5 + $0xa4] ss:$8 sps:$4 sm:$0xff]   ;;  %v831_v32 = vld [vmem:[#allocation5 + $0xa0] ss:$8 sps:$4 sm:$0xff]  }
  0x55   :  { %305 = vmatprep.subr.bf16.mxu0 %v808_v6  ;;  %v859_v31 = vld [vmem:[#allocation7 + $0x20] sm:$0xff]   ;;  %v860_v33 = vld [vmem:[#allocation7 + $0x68] sm:$0xff]   ;;  %v832_v34 = vld [vmem:[#allocation5 + $0xb4] ss:$8 sps:$4 sm:$0xff]  }
  0x56   :  { %740 = vmatpush3.bf16.msra.mxu1 %v853_v20  ;;  %v834_v35 = vld [vmem:[#allocation5 + $0xb0] ss:$8 sps:$4 sm:$0xff]   ;;  %v835_v36 = vld [vmem:[#allocation5 + $0xc4] ss:$8 sps:$4 sm:$0xff]   ;;  %v837_v37 = vld [vmem:[#allocation5 + $0xc0] ss:$8 sps:$4 sm:$0xff]  }
  0x57   :  { %741 = vmatprep.subr.bf16.mxu1 %v854_v21  ;;  %v838_v38 = vld [vmem:[#allocation5 + $0xd4] ss:$8 sps:$4 sm:$0xff]   ;;  %v840_v39 = vld [vmem:[#allocation5 + $0xd0] ss:$8 sps:$4 sm:$0xff]   ;;  %v841_v40 = vld [vmem:[#allocation5 + $0xe4] ss:$8 sps:$4 sm:$0xff]  }
  0x58   :  { %306 = vmatpush1.bf16.msra.mxu0 %v810_v7  ;;  %v843_v41 = vld [vmem:[#allocation5 + $0xe0] ss:$8 sps:$4 sm:$0xff]   ;;  %v844_v42 = vld [vmem:[#allocation5 + $0xf4] ss:$8 sps:$4 sm:$0xff]   ;;  %v846_v43 = vld [vmem:[#allocation5 + $0xf0] ss:$8 sps:$4 sm:$0xff]  }
  0x59   :  { %307 = vmatprep.subr.bf16.mxu0 %v811_v8  ;;  %v847_v44 = vld [vmem:[#allocation2] ss:$8 sps:$4 sm:$0xff]   ;;  %v861_v45 = vld [vmem:[#allocation7 + $0x28] sm:$0xff]   ;;  %v866_v8 = vld [vmem:[#allocation8] sm:$0xff]  }
  0x5a   :  { %742 = vmatpush3.bf16.msra.mxu1 %v855_v24  ;;  %v862_v46 = vld [vmem:[#allocation7 + $0x70] sm:$0xff]   ;;  %v864_v48 = vld [vmem:[#allocation7 + $0x78] sm:$0xff]  }
  0x5b   :  { %743 = vmatprep.subr.bf16.mxu1 %v856_v25  ;;  %v863_v47 = vld [vmem:[#allocation7 + $0x30] sm:$0xff]   ;;  %v865_v49 = vld [vmem:[#allocation7 + $0x38] sm:$0xff]  }
  0x5c   :  { %308 = vmatpush1.bf16.msra.mxu0 %v813_v9  ;;  %v117_v54 = vld [vmem:[%s1130_s2] sm:$0x3]  ;;  %v867_v9 = vld [vmem:[#allocation8 + $0x8] sm:$0xff]   ;;  %v873_v15 = vld [vmem:[#allocation8 + $0x38] sm:$0xff]  }
  0x5d   :  { %309 = vmatprep.subr.bf16.mxu0 %v814_v10  ;;  %v122_v56 = vrot.slane %v117_v54, %v121_v53  ;;  %v126_v57 = vrot.slane %v117_v54, %v125_v55  ;;  %v868_v10 = vld [vmem:[#allocation8 + $0x10] sm:$0xff]  }
  0x5e   :  { %744 = vmatpush3.bf16.msra.mxu1 %v857_v28  ;;  %v702_v17 = vld [vmem:[%s1132_s4] ss:$0 sm:$0xff]  ;;  %s654_s4 = sshll.u32 %s1002_s8, 4  ;;  %s655_s4 = int_to_ptr.vmem [resolvable:$true] %s654_s4 }
  0x5f   :  { %745 = vmatprep.subr.bf16.mxu1 %v858_v29  ;;  %v719_v28 = vld [vmem:[%s1134_s6] ss:$0 sm:$0xff]  ;;  %s962_s9 = scalar_lea.vmem %s655_s4, 128  ;;  %p967_p5 = scmp.lt.s32.totalorder %s655_s4, %s655_s4 }
  0x60   :  { %310 = vmatpush1.bf16.msra.mxu0 %v816_v11  ;;  %v869_v11 = vld [vmem:[#allocation8 + $0x18] sm:$0xff]   ;;  %p963_p4 = scmp.ne.s32.totalorder %s655_s4, %s962_s9  ;;  %p968_p6 = scmp.lt.s32.totalorder %s962_s9, %s962_s9 }
  0x61   :  { %311 = vmatprep.subr.bf16.mxu0 %v817_v12  ;;  %v870_v12 = vld [vmem:[#allocation8 + $0x20] sm:$0xff]  }
  0x62   :  { %746 = vmatpush3.bf16.msra.mxu1 %v859_v31  ;;  %p969_p7 = por %p968_p6, %p967_p5 }
  0x63   :  { %747 = vmatprep.subr.bf16.mxu1 %v860_v33 }
  0x64   :  { %312 = vmatpush1.bf16.msra.mxu0 %v819_v13  ;;  %v871_v13 = vld [vmem:[#allocation8 + $0x28] sm:$0xff]   ;;  %p970_p8 = pnand %p969_p7, %p963_p4 }
  0x65   :  { %313 = vmatprep.subr.bf16.mxu0 %v820_v14  ;;  %v872_v14 = vld [vmem:[#allocation8 + $0x30] sm:$0xff]  }
  0x66   :  { %748 = vmatpush3.bf16.msra.mxu1 %v861_v45 }
  0x67   :  { %749 = vmatprep.subr.bf16.mxu1 %v862_v46 }
  0x68   :  { %314 = vmatpush1.bf16.msra.mxu0 %v822_v18 }
  0x69   :  { %315 = vmatprep.subr.bf16.mxu0 %v823_v22 }
  0x6a   :  { %750 = vmatpush3.bf16.msra.mxu1 %v863_v47 }
  0x6b   :  { %751 = vmatprep.subr.bf16.mxu1 %v864_v48 }
  0x6c   :  { %316 = vmatpush1.bf16.msra.mxu0 %v825_v23 }
  0x6d   :  { %317 = vmatprep.subr.bf16.mxu0 %v826_v26 }
  0x6e   :  { %752 = vmatpush3.bf16.msra.mxu1 %v865_v49 }
  0x6f   :  { %768 = vmatprep.subr.bf16.mxu1 %v1000_v50 }
  0x70   :  { %318 = vmatpush1.bf16.msra.mxu0 %v828_v27 }
  0x71   :  { %319 = vmatprep.subr.bf16.mxu0 %v829_v30 }
  0x74   :  { %320 = vmatpush1.bf16.msra.mxu0 %v831_v32 }
  0x75   :  { %321 = vmatprep.subr.bf16.mxu0 %v832_v34 }
  0x78   :  { %322 = vmatpush1.bf16.msra.mxu0 %v834_v35 }
  0x79   :  { %323 = vmatprep.subr.bf16.mxu0 %v835_v36 }
  0x7c   :  { %324 = vmatpush1.bf16.msra.mxu0 %v837_v37 }
  0x7d   :  { %325 = vmatprep.subr.bf16.mxu0 %v838_v38 }
  0x80   :  { %326 = vmatpush1.bf16.msra.mxu0 %v840_v39 }
  0x81   :  { %327 = vmatprep.subr.bf16.mxu0 %v841_v40 }
  0x84   :  { %328 = vmatpush1.bf16.msra.mxu0 %v843_v41 }
  0x85   :  { %329 = vmatprep.subr.bf16.mxu0 %v844_v42 }
  0x88   :  { %330 = vmatpush1.bf16.msra.mxu0 %v846_v43 }
  0x8b   :  { %332 = vmatmul.mubr.bf16.vlgmr.msra.gmra.mrb[0].mxu0 %v847_v44 }
 0x15e   :  { %v333_v58 = vpop.f32.mrb[0].mxu0 }
 0x15f   :  { %v334_v59 = vadd.f32 %v333_v58, %v122_v56  ;;  %v335_v60 = vpop.f32.mrb[1].mxu0 }
 0x160   :  { %v336_v61 = vadd.f32 %v335_v60, %v126_v57  ;;  %v337_v62 = vpop.f32.mrb[2].mxu0 }
 0x161   :  { %v338_v63 = vadd.f32 %v337_v62, %v122_v56  ;;  %v339_v0 = vpop.f32.mrb[3].mxu0  ;;  %v342_v2 = vmax.f32 %v334_v59, 0.0 }
 0x162   :  { %v340_v1 = vadd.f32 %v339_v0, %v126_v57  ;;  %v343_v4 = vmax.f32 %v336_v61, 0.0 }
 0x163   :  { %v344_v3 = vmax.f32 %v338_v63, 0.0 }
 0x164   :  { %v345_v5 = vmax.f32 %v340_v1, 0.0 }
 0x165   :  { %v346_v6 = vpack.c.bf16 %v344_v3, %v342_v2 }
 0x166   :  { %v347_v7 = vpack.c.bf16 %v345_v5, %v343_v4 }
 0x168   :  { %515 = vmatprep.mubr.bf16.mxu1 %v347_v7 }
 0x169   :  { %516 = vmatmul.mubr.bf16.vlgmr.msra.gmra.mrb[0].mxu1 %v346_v6 }
 0x16a   :  { %769 = vmatpush3.bf16.msra.mxu1 %v866_v8  ;;  %784 = vmatprep.mubr.msk.bf16.mxu1 %vm1001_vm0, %v1000_v50 }
 0x16b   :  { %770 = vmatprep.subr.bf16.mxu1 %v1000_v50 }
 0x16e   :  { %771 = vmatpush3.bf16.msra.mxu1 %v867_v9 }
 0x16f   :  { %772 = vmatprep.subr.bf16.mxu1 %v1000_v50 }
 0x172   :  { %773 = vmatpush3.bf16.msra.mxu1 %v868_v10 }
 0x173   :  { %774 = vmatprep.subr.bf16.mxu1 %v1000_v50 }
 0x176   :  { %775 = vmatpush3.bf16.msra.mxu1 %v869_v11 }
 0x177   :  { %776 = vmatprep.subr.bf16.mxu1 %v1000_v50 }
 0x17a   :  { %777 = vmatpush3.bf16.msra.mxu1 %v870_v12 }
 0x17b   :  { %778 = vmatprep.subr.bf16.mxu1 %v1000_v50 }
 0x17e   :  { %779 = vmatpush3.bf16.msra.mxu1 %v871_v13 }
 0x17f   :  { %780 = vmatprep.subr.bf16.mxu1 %v1000_v50 }
 0x182   :  { %781 = vmatpush3.bf16.msra.mxu1 %v872_v14 }
 0x183   :  { %782 = vmatprep.subr.bf16.mxu1 %v1000_v50 }
 0x186   :  { %783 = vmatpush3.bf16.msra.mxu1 %v873_v15 }
 0x23c   :  { %v753_v16 = vpop.f32.mrb[0].mxu1 }
 0x23d   :  { %v754_v18 = vpop.f32.mrb[1].mxu1 }
 0x23e   :  { %v755_v19 = vadd.f32 %v754_v18, %v753_v16  ;;  %v756_v20 = vpop.f32.mrb[2].mxu1 }
 0x23f   :  { %v757_v21 = vpop.f32.mrb[3].mxu1 }
 0x240   :  { %v518_v22 = vadd.f32 %v755_v19, %v702_v17  ;;  %v758_v23 = vadd.f32 %v757_v21, %v756_v20 }
 0x242   :  { %v521_v24 = vadd.f32 %v758_v23, %v702_v17  ;;  %v524_v25 = vmax.f32 %v518_v22, 0.0 }
 0x244   :  { %v525_v26 = vmax.f32 %v521_v24, 0.0 }
 0x246   :  { %v526_v27 = vpack.c.bf16 %v525_v26, %v524_v25 }
 0x248   :  { %785 = vmatmul.mubr.bf16.vlgmr.msra.gmra.mrb[4].mxu1 %v526_v27 }
 0x31b   :  { %v632_v29 = vpop.f32.mrb[4].mxu1 }
 0x31c   :  { %v786_v30 = vpop.f32.mrb[5].mxu1  ;;  %v633_v32 = vadd.f32 %v719_v28, %v632_v29 }
 0x31d   :  { %v635_v31 = vpop.f32.mrb[6].mxu1 }
 0x31e   :  { %v636_v33 = vadd.f32 %v719_v28, %v635_v31  ;;  %v787_v34 = vpop.f32.mrb[7].mxu1 }
 0x320   :  { %v735_v35 = vpack.c.bf16 %v636_v33, %v633_v32 }
 0x322   :  { %736 = vst [vmem:[#allocation10] sm:$0xff] %v735_v35  }
 0x323   :  { %973 = shalt.err (!%p970_p8)
}
 0x324   :  { %s974_s11 = scalar_lea.hbm %s1135_s7, 128 }
 0x325   :  { %p975_p9 = scmp.ne.s32.totalorder %s1135_s7, %s974_s11  ;;  %p978_p10 = scmp.lt.u32.totalorder %s974_s11, %s1135_s7 }
 0x327   :  { %p980_p11 = pnand %p978_p10, %p975_p9 }
 0x329   :  { %983 = shalt.err (!%p980_p11)
}
 0x32a   :  { %660 = dma.vmem_to_hbm [thread:$0]  %s655_s4, 128, %s1135_s7, [#allocation4], %s997_s0, %s997_s0, %s998_s27  }
 0x32b   :  { %990 = dma.done.wait [#allocation4], 128  }
 0x32c   :  { %991 = vsyncadd [#allocation4], 4294967168 }
 0x32d   :  { %664 = vsyncpa [#allocation3], 1 }
 0x32e   :  { %665 = vsyncpa [#allocation6], 1 }
 0x32f   :  { %666 = vsyncpa [#allocation9], 1 }
 0x330   :  { %667 = vsyncpa [#allocation4], 1 }

</bundles_post_ra>
